<compile_context>
chip_gen: v5e
topology: v5e:2x2
jax: 0.10.0
libtpu: 0.0.40
codegen_flags: <defaults>
</compile_context>

<pallas_src>
import functools
import math

import jax
import jax.numpy as jnp
from jax.experimental import pallas as pl
from jax.experimental.pallas import tpu as pltpu


def _pe_add_kernel(x_ref, freq_ref, phase_ref, o_ref, *, batch_rep):
    # x_ref:     (seq_tile, batch_rep * E) tile of the input (lane-dense view)
    # freq_ref:  (1, E) per-embed-column angular frequency  (div_term[e // 2])
    # phase_ref: (1, E) 0.0 for sin columns (even e), pi/2 for cos columns (odd e)
    rows = x_ref.shape[0]
    base = pl.program_id(0) * rows                                   # int32 scalar
    pos_i = base + jax.lax.broadcasted_iota(jnp.int32, (rows, 1), dimension=0)
    pos = pos_i.astype(jnp.float32)                                  # exact (< 2^24)
    # Single EUP transcendental per (row, embed) element; batch handled by replication.
    pe = jnp.sin(pos * freq_ref[...] + phase_ref[...])               # (rows, E), f32
    if batch_rep > 1:
        pe = jnp.concatenate([pe] * batch_rep, axis=-1)              # (rows, batch_rep*E)
    # f32 add, single downcast at the store.
    o_ref[...] = (x_ref[...].astype(jnp.float32) + pe).astype(o_ref.dtype)


def sinusoidal_positional_encoding(x: jnp.ndarray,
                                   max_len: int = 1024,
                                   seq_tile: int | None = None) -> jnp.ndarray:
    """x: (S, B, E)  ->  x + sinusoidal_pe[:S] broadcast over batch."""
    S, B, E = x.shape
    assert S <= max_len, f"seq_len {S} exceeds max_len {max_len}"
    assert E % 2 == 0, "embed_size must be even (matches the PyTorch pe layout)"
    cols = B * E
    x2 = x.reshape(S, cols)                          # contiguous view, lane-dense last dim

    # Per-embed-column constants (length E, batch independent).
    div_term = jnp.exp(
        jnp.arange(0, E, 2, dtype=jnp.float32) * (-math.log(10000.0) / E)
    )                                                # (E//2,)
    e_idx = jnp.arange(E)
    freq = div_term[e_idx // 2][None, :]                              # (1, E)
    phase = ((e_idx % 2).astype(jnp.float32) * (math.pi / 2))[None, :]  # (1, E)

    itemsize = jnp.dtype(x.dtype).itemsize
    sublane = 16 if itemsize == 2 else 8             # bf16 packs 16 rows per vreg

    # --- column (batch) tiling: bound per-step VMEM when a single row is huge
    #     (matters most on v7x's 64 MiB physical VMEM); also gives a 2-D parallel grid.
    batch_rep, col_tile = B, cols
    if B > 1 and cols * itemsize > (2 << 20):
        bt = min(B, max(1, (2 << 20) // max(E * itemsize, 1)))
        while bt > 1 and (B % bt != 0 or (bt * E) % 128 != 0):
            bt -= 1
        if bt < B and bt >= 1 and B % bt == 0 and (bt * E) % 128 == 0:
            batch_rep, col_tile = bt, bt * E

    # --- seq tiling: ~2 MiB of x per step keeps the double-buffered pipeline at the
    #     HBM roofline while in+out working set (~4x tile) stays far under 32 MiB.
    auto_tile = seq_tile is None
    if auto_tile:
        target_bytes = 2 << 20
        seq_tile = max(sublane,
                       (target_bytes // max(col_tile * itemsize, 1)) // sublane * sublane)
    if seq_tile >= S:
        seq_tile = S                                 # full-dim block is always layout-legal
    else:
        seq_tile = max(sublane, (seq_tile // sublane) * sublane)

    n_col = cols // col_tile
    # v7x has 2 TensorCores: make sure a "parallel" grid has >= 2 steps when possible.
    if auto_tile and seq_tile == S and n_col == 1 and S >= 2 * sublane:
        seq_tile = max(sublane, ((S // 2) // sublane) * sublane)

    grid = (pl.cdiv(S, seq_tile), n_col)             # partial last block handled by masking

    kernel = functools.partial(_pe_add_kernel, batch_rep=batch_rep)
    out2 = pl.pallas_call(
        kernel,
        out_shape=jax.ShapeDtypeStruct((S, cols), x.dtype),
        grid=grid,
        in_specs=[
            pl.BlockSpec((seq_tile, col_tile), lambda i, j: (i, j)),
            pl.BlockSpec((1, E), lambda i, j: (0, 0)),   # constant block: fetched once
            pl.BlockSpec((1, E), lambda i, j: (0, 0)),
        ],
        out_specs=pl.BlockSpec((seq_tile, col_tile), lambda i, j: (i, j)),
        compiler_params=pltpu.CompilerParams(
            dimension_semantics=("parallel", "parallel"),  # megacore sharding on v7x
            vmem_limit_bytes=32 * 1024 * 1024,
        ),
    )(x2, freq, phase)

    return out2.reshape(S, B, E)


def _reference_pe(embed_size: int, max_len: int = 1024) -> jnp.ndarray:
    """Plain-JAX mirror of the PyTorch __init__ pe buffer: (max_len, 1, E)."""
    position = jnp.arange(0, max_len, dtype=jnp.float32)[:, None]
    div_term = jnp.exp(
        jnp.arange(0, embed_size, 2, dtype=jnp.float32)
        * (-math.log(10000.0) / embed_size)
    )
    angles = position * div_term
    pe = jnp.zeros((max_len, embed_size), dtype=jnp.float32)
    pe = pe.at[:, 0::2].set(jnp.sin(angles))
    pe = pe.at[:, 1::2].set(jnp.cos(angles))
    return pe[:, None, :]


if __name__ == "__main__":
    embed_size = 32
    max_len = 1024
    batch = 2

    pe_ref = _reference_pe(embed_size, max_len)

    # --- test 1: small shape, single block -----------------------------------
    seq_len = 8
    x = jax.random.normal(jax.random.PRNGKey(0),
                          (seq_len, batch, embed_size), dtype=jnp.float32)
    out = jax.block_until_ready(sinusoidal_positional_encoding(x, max_len))
    ref = x + pe_ref[:seq_len]
    assert out.shape == x.shape and out.dtype == x.dtype
    assert jnp.allclose(out, ref, atol=1e-5, rtol=1e-5), "mismatch vs reference (test 1)"

    # --- test 2: multi-step grid with a partial (masked) last block -----------
    seq_len2 = 20
    x2 = jax.random.normal(jax.random.PRNGKey(1),
                           (seq_len2, batch, embed_size), dtype=jnp.float32)
    out2 = jax.block_until_ready(
        sinusoidal_positional_encoding(x2, max_len, seq_tile=8))
    ref2 = x2 + pe_ref[:seq_len2]
    assert jnp.allclose(out2, ref2, atol=1e-5, rtol=1e-5), "mismatch vs reference (test 2)"

    # --- test 3: bf16 path (f32 add, single downcast at the store) ------------
    seq_len3 = 16
    x3 = jax.random.normal(jax.random.PRNGKey(2),
                           (seq_len3, batch, embed_size), dtype=jnp.bfloat16)
    out3 = jax.block_until_ready(sinusoidal_positional_encoding(x3, max_len))
    ref3 = (x3.astype(jnp.float32) + pe_ref[:seq_len3]).astype(jnp.bfloat16)
    assert out3.dtype == jnp.bfloat16
    assert jnp.allclose(out3.astype(jnp.float32), ref3.astype(jnp.float32),
                        atol=3e-2, rtol=2e-2), "mismatch vs reference (test 3)"

    print("KERNEL_OK")
</pallas_src>

<mosaic_0001>
module attributes {stable_mosaic.version = 11 : i64} {
  func.func @_pe_add_kernel(%arg0: i32, %arg1: i32, %arg2: memref<8x64xf32, #tpu.memory_space<vmem>>, %arg3: memref<1x32xf32, #tpu.memory_space<vmem>>, %arg4: memref<1x32xf32, #tpu.memory_space<vmem>>, %arg5: memref<8x64xf32, #tpu.memory_space<vmem>>) attributes {dimension_semantics = [#tpu.dimension_semantics<parallel>, #tpu.dimension_semantics<parallel>], iteration_bounds = array<i64: 1, 1>, scalar_prefetch = 0 : i64, scratch_operands = 0 : i64, tpu.core_type = #tpu.core_type<tc>, window_params = [{transform_indices = @transform_0, window_bounds = array<i64: 8, 64>}, {pipeline_mode = #tpu.pipeline_mode<synchronous>, transform_indices = @transform_1, window_bounds = array<i64: 1, 32>}, {pipeline_mode = #tpu.pipeline_mode<synchronous>, transform_indices = @transform_2, window_bounds = array<i64: 1, 32>}, {transform_indices = @transform_3, window_bounds = array<i64: 8, 64>}]} {
    %c8_i32 = arith.constant 8 : i32
    %0 = arith.muli %arg0, %c8_i32 : i32
    %1 = tpu.iota {dimensions = array<i32: 0>} : vector<8x1xi32>
    %2 = vector.broadcast %0 : i32 to vector<8x1xi32>
    %3 = arith.addi %2, %1 : vector<8x1xi32>
    %4 = arith.sitofp %3 : vector<8x1xi32> to vector<8x1xf32>
    %c0 = arith.constant 0 : index
    %c0_0 = arith.constant 0 : index
    %5 = vector.load %arg3[%c0, %c0_0] : memref<1x32xf32, #tpu.memory_space<vmem>>, vector<1x32xf32>
    %6 = vector.broadcast %4 : vector<8x1xf32> to vector<8x32xf32>
    %7 = vector.broadcast %5 : vector<1x32xf32> to vector<8x32xf32>
    %8 = arith.mulf %6, %7 : vector<8x32xf32>
    %c0_1 = arith.constant 0 : index
    %c0_2 = arith.constant 0 : index
    %9 = vector.load %arg4[%c0_1, %c0_2] : memref<1x32xf32, #tpu.memory_space<vmem>>, vector<1x32xf32>
    %10 = vector.broadcast %9 : vector<1x32xf32> to vector<8x32xf32>
    %11 = arith.addf %8, %10 : vector<8x32xf32>
    %12 = math.sin %11 : vector<8x32xf32>
    %13 = tpu.concatenate %12, %12 in 1 : vector<8x32xf32>, vector<8x32xf32> -> vector<8x64xf32>
    %c0_3 = arith.constant 0 : index
    %c0_4 = arith.constant 0 : index
    %14 = vector.load %arg2[%c0_3, %c0_4] : memref<8x64xf32, #tpu.memory_space<vmem>>, vector<8x64xf32>
    %15 = arith.addf %14, %13 : vector<8x64xf32>
    %c0_5 = arith.constant 0 : index
    %c0_6 = arith.constant 0 : index
    %16 = vector.load %arg5[%c0_5, %c0_6] : memref<8x64xf32, #tpu.memory_space<vmem>>, vector<8x64xf32>
    tpu.vector_store %arg5[%c0_5, %c0_6], %15 {strides = array<i32>} : memref<8x64xf32, #tpu.memory_space<vmem>>, vector<8x64xf32>,
    return
  }
  func.func @transform_0(%arg0: i32, %arg1: i32) -> (i32, i32) {
    %c0_i32 = arith.constant 0 : i32
    return %arg0, %arg1 : i32, i32
  }
  func.func @transform_1(%arg0: i32, %arg1: i32) -> (i32, i32) {
    %c0_i32 = arith.constant 0 : i32
    %c0_i32_0 = arith.constant 0 : i32
    %c0_i32_1 = arith.constant 0 : i32
    return %c0_i32, %c0_i32_0 : i32, i32
  }
  func.func @transform_2(%arg0: i32, %arg1: i32) -> (i32, i32) {
    %c0_i32 = arith.constant 0 : i32
    %c0_i32_0 = arith.constant 0 : i32
    %c0_i32_1 = arith.constant 0 : i32
    return %c0_i32, %c0_i32_0 : i32, i32
  }
  func.func @transform_3(%arg0: i32, %arg1: i32) -> (i32, i32) {
    %c0_i32 = arith.constant 0 : i32
    return %arg0, %arg1 : i32, i32
  }
}

</mosaic_0001>

<bundles_post_ra>
// kernel: tpu_custom_call.1
= control target key start
LH: loop header
LB: loop body
LE: loop exit
PB: predicated region body
PF: predicated region fallthrough
CT: control target
= control target key end

     0   :  { %8 = vsyncpa [#allocation3], 0  ;;  %s425_s0 = inlined_call_operand.hbm [shape: f32[8,64], index: 0, kind: input, shape index: {}]   ;;  %s426_s1 = inlined_call_operand.hbm [shape: f32[1,32], index: 1, kind: input, shape index: {}]   ;;  %s427_s2 = inlined_call_operand.vmem [shape: f32[1,32], index: 2, kind: input, shape index: {}]   ;;  %s428_s3 = inlined_call_operand.hbm [shape: f32[8,64], index: 3, kind: output, shape index: {}]  }
   0x1   :  { %9 = vsyncpa [#allocation6], 0 }
   0x2   :  { %10 = vsyncpa [#allocation4], 0  ;;  %s16_s14 = sshll.u32 %s425_s0, 4  ;;  %s336_s15 = smov [#allocation2]   ;;  %s17_s14 = int_to_ptr.hbm [resolvable:$true] %s16_s14 }
   0x3   :  { %s18_s16 = sshll.u32 %s336_s15, 4  ;;  %s27_s19 = sshll.u32 %s426_s1, 4  ;;  %s19_s16 = int_to_ptr.vmem [resolvable:$true] %s18_s16  ;;  %s28_s19 = int_to_ptr.hbm [resolvable:$true] %s27_s19 }
   0x4   :  { %21 = dma.hbm_to_vmem [thread:$0]  %s17_s14, 128, %s19_s16, [#allocation3]  }
   0x5   :  { %s337_s20 = smov [#allocation5]  }
   0x6   :  { %s29_s21 = sshll.u32 %s337_s20, 4  ;;  %s30_s21 = int_to_ptr.vmem [resolvable:$true] %s29_s21 }
   0x7   :  { %32 = dma.hbm_to_vmem [thread:$0]  %s28_s19, 16, %s30_s21, [#allocation6]  }
   0x8   :  { %330 = dma.done.wait [#allocation3], 128  }
   0x9   :  { %331 = vsyncadd [#allocation3], 4294967168 }
   0xa   :  { %332 = dma.done.wait [#allocation6], 16  }
   0xb   :  { %333 = vsyncadd [#allocation6], 4294967280  ;;  %v44_v0 = vlaneseq  ;;  %v256_v3 = vld [vmem:[#allocation5] ss:$0 sm:$0xff]  ;;  %v257_v4 = vld [vmem:[%s427_s2] ss:$0 sm:$0xff] }
   0xc   :  { %v338_v18 = vmov 683565275   ;;  %v339_v20 = vmov 2475754826   ;;  %v340_v22 = vmov 2131351028  }
   0xd   :  { %v45_v1 = vshrl.u32 %v44_v0, 7  ;;  %v341_v24 = vmov 2102212464   ;;  %v342_v26 = vmov 920167782   ;;  %s345_s1 = smov 32  }
   0xe   :  { %v343_v32 = vmov 1326507024   ;;  %s346_s2 = smov [#allocation7]   ;;  %s231_s26 = sshll.u32 %s428_s3, 4  ;;  %s232_s26 = int_to_ptr.hbm [resolvable:$true] %s231_s26 }
   0xf   :  { %v48_v2 = vcvt.s32.f32 %v45_v1  ;;  %s229_s23 = sshll.u32 %s346_s2, 4  ;;  %s230_s23 = int_to_ptr.vmem [resolvable:$true] %s229_s23 }
  0x11   :  { %v53_v5 = vmul.f32 %v256_v3, %v48_v2 }
  0x13   :  { %v376_v6 = vadd.f32 %v257_v4, %v53_v5 }
  0x15   :  { %v62_v7 = vand.u32 2139095040, %v376_v6  ;;  %v59_v9 = vand.u32 2147483647, %v376_v6  ;;  %vm61_vm12 = vcmp.lt.s32.totalorder %v376_v6, 0 }
  0x17   :  { %v63_v8 = vshrl.u32 %v62_v7, 23  ;;  %v66_v12 = vand.u32 8388607, %v59_v9  ;;  %v344_v7 = vmov 0   ;;  %vm60_vm13 = vcmp.le.f32.partialorder %v59_v9, 0.7853982 }
  0x19   :  { %v242_v10 = vadd.s32 4294967169, %v63_v8  ;;  %v67_v15 = vor.u32 8388608, %v66_v12 }
  0x1b   :  { %v69_v11 = vadd.s32 1, %v242_v10  ;;  %v385_v34 = vshll.u32 %v67_v15, 8 }
  0x1d   :  { %vm70_vm0 = vcmp.gt.s32.totalorder %v69_v11, 0  ;;  %v108_v46 = vand.u32 65535, %v385_v34  ;;  %v109_v47 = vshrl.u32 %v385_v34, 16 }
  0x1e   :  { %v71_v13 = vsel %vm70_vm0, %v69_v11, 0 }
  0x1f   :  { %v73_v14 = vand.u32 31, %v71_v13  ;;  %v382_v16 = vshrl.u32 %v71_v13, 5 }
  0x21   :  { %v74_v17 = vsub.s32 32, %v73_v14  ;;  %v76_v19 = vshll.u32 %v338_v18, %v73_v14  ;;  %v79_v21 = vshll.u32 %v339_v20, %v73_v14  ;;  %v82_v23 = vshll.u32 %v340_v22, %v73_v14 }
  0x22   :  { %v85_v25 = vshll.u32 %v341_v24, %v73_v14  ;;  %v88_v27 = vshll.u32 %v342_v26, %v73_v14  ;;  %vm91_vm1 = vcmp.lt.s32.totalorder %v382_v16, 1  ;;  %vm94_vm2 = vcmp.lt.s32.totalorder %v382_v16, 4 }
  0x23   :  { %v77_v28 = vshrl.u32 %v339_v20, %v74_v17  ;;  %v80_v29 = vshrl.u32 %v340_v22, %v74_v17  ;;  %v83_v30 = vshrl.u32 %v341_v24, %v74_v17  ;;  %v86_v31 = vshrl.u32 %v342_v26, %v74_v17 }
  0x24   :  { %v89_v33 = vshrl.u32 %v343_v32, %v74_v17  ;;  %vm93_vm3 = vcmp.lt.s32.totalorder %v382_v16, 3  ;;  %vm92_vm4 = vcmp.lt.s32.totalorder %v382_v16, 2  ;;  %v75_v54 = vshrl.u32 %v338_v18, %v74_v17 }
  0x25   :  { %v78_v35 = vor.u32 %v77_v28, %v76_v19  ;;  %v81_v36 = vor.u32 %v80_v29, %v79_v21  ;;  %v84_v37 = vor.u32 %v83_v30, %v82_v23  ;;  %v87_v38 = vor.u32 %v86_v31, %v85_v25 }
  0x26   :  { %v90_v39 = vor.u32 %v89_v33, %v88_v27 }
  0x27   :  { %v99_v40 = vsel %vm91_vm1, %v78_v35, %v81_v36  ;;  %v103_v41 = vsel %vm91_vm1, %v81_v36, %v84_v37  ;;  %v100_v42 = vsel %vm94_vm2, %v87_v38, 920167782  ;;  %v95_v3 = vsel %vm91_vm1, %v75_v54, %v78_v35 }
  0x28   :  { %v104_v43 = vsel %vm94_vm2, %v90_v39, 1326507024  ;;  %v101_v44 = vsel %vm93_vm3, %v84_v37, %v100_v42  ;;  %v96_v5 = vsel %vm94_vm2, %v84_v37, 2102212464  ;;  %vm202_vm1 = vweird.f32 %v376_v6 }
  0x29   :  { %v105_v45 = vsel %vm93_vm3, %v87_v38, %v104_v43  ;;  %v102_v48 = vsel %vm92_vm4, %v99_v40, %v101_v44  ;;  %v97_v18 = vsel %vm93_vm3, %v81_v36, %v96_v5  ;;  %vm218_vm2 = vcmask 261120  }
  0x2a   :  { %v106_v49 = vsel %vm92_vm4, %v103_v41, %v105_v45  ;;  %v132_v52 = vand.u32 65535, %v102_v48  ;;  %v133_v53 = vshrl.u32 %v102_v48, 16  ;;  %v98_v26 = vsel %vm92_vm4, %v95_v3, %v97_v18 }
  0x2b   :  { %v110_v50 = vand.u32 65535, %v106_v49  ;;  %v111_v51 = vshrl.u32 %v106_v49, 16  ;;  %v152_v30 = vmul.u32 %v385_v34, %v98_v26  ;;  %vm222_vm3 = vcmask 523264  }
  0x2c   :  { %v134_v58 = vmul.u32 %v132_v52, %v108_v46  ;;  %v135_v59 = vmul.u32 %v133_v53, %v108_v46  ;;  %v136_v60 = vmul.u32 %v132_v52, %v109_v47  ;;  %v137_v0 = vmul.u32 %v133_v53, %v109_v47 }
  0x2d   :  { %v112_v55 = vmul.u32 %v110_v50, %v108_v46  ;;  %v113_v56 = vmul.u32 %v111_v51, %v108_v46  ;;  %v114_v57 = vmul.u32 %v110_v50, %v109_v47  ;;  %v115_v61 = vmul.u32 %v111_v51, %v109_v47 }
  0x2e   :  { %v138_v1 = vshll.u32 %v135_v59, 16  ;;  %v140_v2 = vshll.u32 %v136_v60, 16  ;;  %v139_v15 = vshrl.u32 %v135_v59, 16  ;;  %v141_v22 = vshrl.u32 %v136_v60, 16 }
  0x2f   :  { %v116_v62 = vshll.u32 %v113_v56, 16  ;;  %v118_v63 = vshll.u32 %v114_v57, 16  ;;  %v117_v11 = vshrl.u32 %v113_v56, 16  ;;  %v119_v19 = vshrl.u32 %v114_v57, 16 }
  0x30   :  { %vm142_vm6 = vc.u32 %v134_v58, %v138_v1  ;;  %v144_v10 = vadd.s32 %v138_v1, %v134_v58 }
  0x31   :  { %vm120_vm5 = vc.u32 %v112_v55, %v116_v62  ;;  %v122_v4 = vadd.s32 %v116_v62, %v112_v55  ;;  %v143_v13 = vsel %vm142_vm6, 1, %v344_v7 }
  0x32   :  { %v121_v8 = vsel %vm120_vm5, 1, %v344_v7  ;;  %v145_v17 = vadd.s32 %v143_v13, %v137_v0  ;;  %vm146_vm8 = vc.u32 %v144_v10, %v140_v2  ;;  %v148_v25 = vadd.s32 %v144_v10, %v140_v2 }
  0x33   :  { %v123_v12 = vadd.s32 %v121_v8, %v115_v61  ;;  %vm124_vm7 = vc.u32 %v122_v4, %v118_v63  ;;  %v147_v21 = vsel %vm146_vm8, 1, %v344_v7 }
  0x34   :  { %v125_v14 = vsel %vm124_vm7, 1, %v344_v7  ;;  %v149_v23 = vadd.s32 %v147_v21, %v145_v17 }
  0x35   :  { %v127_v20 = vadd.s32 %v125_v14, %v123_v12 }
  0x36   :  { %v150_v27 = vadd.s32 %v149_v23, %v139_v15 }
  0x37   :  { %v128_v24 = vadd.s32 %v127_v20, %v117_v11  ;;  %v220_v20 = vld [vmem:[#allocation2] sm:$0xff] }
  0x38   :  { %v151_v29 = vadd.s32 %v150_v27, %v141_v22 }
  0x39   :  { %v129_v28 = vadd.s32 %v128_v24, %v119_v19 }
  0x3a   :  { %v155_v31 = vadd.s32 1, %v151_v29 }
  0x3b   :  { %vm154_vm9 = vc.u32 %v129_v28, %v148_v25  ;;  %v153_v16 = vadd.s32 %v148_v25, %v129_v28 }
  0x3c   :  { %v156_v32 = vsel %vm154_vm9, %v155_v31, %v151_v29 }
  0x3d   :  { %v157_v33 = vadd.s32 %v156_v32, %v152_v30 }
  0x3f   :  { %v158_v35 = vadd.s32 536870912, %v157_v33 }
  0x41   :  { %v159_v36 = vshrl.u32 %v158_v35, 30 }
  0x43   :  { %v160_v37 = vshll.u32 %v159_v36, 30  ;;  %v183_v54 = vsub.s32 4, %v159_v36 }
  0x45   :  { %v161_v38 = vsub.s32 %v157_v33, %v160_v37  ;;  %v184_v57 = vsel %vm61_vm12, %v183_v54, %v159_v36 }
  0x46   :  { %v186_v60 = vsel %vm60_vm13, 0, %v184_v57 }
  0x47   :  { %vm162_vm10 = vcmp.lt.s32.totalorder %v161_v38, 0  ;;  %v163_v39 = vsub.s32 0, %v161_v38  ;;  %v203_v1 = vadd.s32 3, %v186_v60 }
  0x49   :  { %v164_v40 = vsel %vm162_vm10, %v163_v39, %v161_v38  ;;  %v204_v7 = vand.u32 3, %v203_v1 }
  0x4a   :  { %v165_v41 = vclz %v164_v40 }
  0x4b   :  { %vm209_vm14 = vcmp.eq.s32.totalorder %v204_v7, 2  ;;  %vm206_vm15 = vcmp.eq.s32.totalorder %v204_v7, 0  ;;  %vm205_vm0 = vcmp.lt.s32.totalorder %v204_v7, 2 }
  0x4c   :  { %v243_v42 = vadd.s32 4294967294, %v165_v41 }
  0x4e   :  { %vm244_vm11 = vcmp.lt.s32.totalorder %v243_v42, 0 }
  0x4f   :  { %v168_v43 = vsel %vm244_vm11, 0, %v243_v42 }
  0x50   :  { %v169_v44 = vsub.s32 32, %v168_v43  ;;  %v170_v45 = vshll.u32 %v161_v38, %v168_v43  ;;  %v173_v46 = vsub.s32 4294967266, %v168_v43 }
  0x52   :  { %v171_v34 = vshrl.u32 %v153_v16, %v169_v44  ;;  %v174_v47 = vadd.s32 127, %v173_v46 }
  0x54   :  { %v172_v48 = vor.u32 %v171_v34, %v170_v45  ;;  %v175_v49 = vshll.u32 %v174_v47, 23 }
  0x56   :  { %v176_v50 = vor.u32 4788187, %v175_v49  ;;  %v179_v51 = vcvt.s32.f32 %v172_v48 }
  0x58   :  { %v177_v52 = vand.u32 2147483647, %v176_v50 }
  0x5a   :  { %v180_v53 = vmul.f32 %v179_v51, %v177_v52 }
  0x5c   :  { %v181_v55 = vxor.u32 2147483648, %v180_v53 }
  0x5e   :  { %v182_v56 = vsel %vm61_vm12, %v181_v55, %v180_v53 }
  0x5f   :  { %v185_v58 = vsel %vm60_vm13, %v376_v6, %v182_v56 }
  0x60   :  { %v187_v59 = vmul.f32 %v185_v58, %v185_v58 }
  0x62   :  { %v188_v61 = vmul.f32 -0.001358992, %v187_v59  ;;  %v195_v62 = vmul.f32 -0.00019511016, %v187_v59 }
  0x64   :  { %v189_v63 = vadd.f32 0.041655596, %v188_v61  ;;  %v196_v0 = vadd.f32 0.008332121, %v195_v62 }
  0x66   :  { %v190_v2 = vmul.f32 %v189_v63, %v187_v59  ;;  %v197_v3 = vmul.f32 %v196_v0, %v187_v59 }
  0x68   :  { %v191_v4 = vadd.f32 -0.4999988, %v190_v2  ;;  %v198_v5 = vadd.f32 -0.16666654, %v197_v3 }
  0x6a   :  { %v192_v8 = vmul.f32 %v191_v4, %v187_v59  ;;  %v199_v10 = vmul.f32 %v198_v5, %v187_v59 }
  0x6c   :  { %v193_v9 = vadd.f32 1.0, %v192_v8  ;;  %v200_v11 = vadd.f32 1.0, %v199_v10 }
  0x6e   :  { %v201_v12 = vmul.f32 %v200_v11, %v185_v58  ;;  %v210_v13 = vxor.u32 2147483648, %v193_v9 }
  0x70   :  { %v207_v14 = vxor.u32 2147483648, %v201_v12  ;;  %v211_v15 = vsel %vm209_vm14, %v210_v13, %v201_v12 }
  0x72   :  { %v208_v17 = vsel %vm206_vm15, %v193_v9, %v207_v14 }
  0x73   :  { %v212_v18 = vsel %vm205_vm0, %v208_v17, %v211_v15 }
  0x74   :  { %v213_v19 = vsel %vm202_vm1, nan, %v212_v18 }
  0x75   :  { %215 = vrot.lane.b32.xlu0 %v213_v19, %s345_s1 }
  0xe7   :  { %v216_v21 = vpop.permute.xlu0 %215 }
  0xe8   :  { %v219_v22 = vsel %vm218_vm2, %v213_v19, %v216_v21 }
  0xe9   :  { %v221_v23 = vadd.f32 %v220_v20, %v219_v22 }
  0xeb   :  { %223 = vst.msk [vmem:[#allocation7] sm:$0xff] %vm222_vm3, %v221_v23 }
  0xec   :  { %234 = dma.vmem_to_hbm [thread:$0]  %s230_s23, 128, %s232_s26, [#allocation4]  }
  0xed   :  { %334 = dma.done.wait [#allocation4], 128  }
  0xee   :  { %335 = vsyncadd [#allocation4], 4294967168 }
  0xef   :  { %239 = vsyncpa [#allocation3], 1 }
  0xf0   :  { %240 = vsyncpa [#allocation6], 1 }
  0xf1   :  { %241 = vsyncpa [#allocation4], 1 }

</bundles_post_ra>
